<compile_context>
chip_gen: v7x
topology: tpu7x:2x2x1
jax: 0.10.0
libtpu: 0.0.40
codegen_flags: <defaults>
</compile_context>

<pallas_src>
import functools

import jax
import jax.numpy as jnp
from jax.experimental import pallas as pl
from jax.experimental.pallas import tpu as pltpu


def _round_up(n: int, m: int) -> int:
    return ((n + m - 1) // m) * m


def _w_slab_layout(D, H1, H, Hd):
    """Row offsets of each weight block inside the packed (rows, lane) slab.

    Every block starts at an 8-row-aligned offset so in-kernel ref slices are
    sublane-aligned; lane width covers the widest block, rounded up to 128.
    """
    lane = _round_up(max(H1, D * H, D * Hd, D), 128)
    off = {}
    r = 0
    off["w1"] = r;  r += _round_up(D, 8)           # (D, H1)        exclusive_net layer 1
    off["w2"] = r;  r += _round_up(H1, 8)          # (H1, D*H)      exclusive_net layer 2
    off["whx"] = r; r += _round_up(D * H + D, 8)   # (D*H+D, D*Hd)  fused [Wh_bd ; Wx_exp]
    off["wo"] = r;  r += _round_up(D * Hd, 8)      # (D*Hd, D)      block-diag Wo (pre-transposed)
    return off, r, lane


# --------------------------------------------------------------------------
# Fused kernel: exclusive_net -> dimwise_net (block-diagonal, lane-dense)
# --------------------------------------------------------------------------
def model_exact_kernel(sc_ref, x_ref, w_ref, b_ref, out_ref,
                       *, D, H1, H, Hd, compute_dtype):
    t = sc_ref[0, 0]
    bo = sc_ref[0, 1]
    x = x_ref[...]                                            # (TB, D) f32

    DH, DHd = D * H, D * Hd
    off, _, _ = _w_slab_layout(D, H1, H, Hd)
    cd = compute_dtype

    # Static, 8-row-aligned views into the packed weight slab.
    w1 = w_ref[off["w1"]:off["w1"] + D, 0:H1]                 # (D, H1)
    w2 = w_ref[off["w2"]:off["w2"] + H1, 0:DH]                # (H1, D*H)
    whx = w_ref[off["whx"]:off["whx"] + DH + D, 0:DHd]        # (D*H+D, D*Hd)
    wo = w_ref[off["wo"]:off["wo"] + DHd, 0:D]                # (D*Hd, D)  no .T needed

    b = b_ref[...]                                            # (8, lane) f32
    b1 = b[0:1, 0:H1]
    tb1 = b[1:2, 0:H1]
    b2 = b[2:3, 0:DH]
    wt_t = b[3:4, 0:DHd]
    bd_t = b[4:5, 0:DHd]

    # Hoisted time-conditioned biases (computed once per grid step, f32).
    bias1 = t * tb1 + b1                                      # (1, H1)
    biasd = t * wt_t + bd_t                                   # (1, D*Hd)

    # ---- exclusive_net(t, x) -> h : (TB, D*H), lane-dense ----
    h1 = jnp.tanh(
        jnp.dot(x.astype(cd), w1.astype(cd), preferred_element_type=jnp.float32)
        + bias1
    )
    h = jnp.dot(h1.astype(cd), w2.astype(cd), preferred_element_type=jnp.float32) + b2

    # ---- dimwise_net(t, x_flat, h_flat), block-diagonal & fused ----
    # Equivalent to u = tanh(x_flat*wx + h_flat@Wh + t*wt + bd); o = u@Wo + bo,
    # but as ONE (TB, D*H+D) @ (D*H+D, D*Hd) matmul: h in lanes 0:D*H and x in
    # lanes D*H:D*H+D (128-aligned offset), against the stacked weight block.
    hx = jnp.concatenate([h, x], axis=-1)                     # (TB, D*H + D)
    u = jnp.tanh(
        jnp.dot(hx.astype(cd), whx.astype(cd), preferred_element_type=jnp.float32)
        + biasd
    )                                                         # (TB, D*Hd)
    out = jnp.dot(u.astype(cd), wo.astype(cd), preferred_element_type=jnp.float32) + bo
    out_ref[...] = out.astype(out_ref.dtype)                  # (TB, D)


# --------------------------------------------------------------------------
# Host-side parameter packing (done once per parameter set)
# --------------------------------------------------------------------------
def pack_params(params, *, D, H1, H, Hd):
    """Pack the 11 parameter tensors into one weight slab, one bias slab, and bo.

    Block-diagonal construction preserves the row-major (B, D*H) -> (B*D, H)
    and (B*D, 1) -> (B, D) ordering of the reference .view/.reshape calls.
    """
    (w1, b1, tb1, w2, b2, wx, wh, wt, bd, wo, bo) = params
    DH, DHd = D * H, D * Hd
    off, rows, lane = _w_slab_layout(D, H1, H, Hd)

    eye = jnp.eye(D, dtype=jnp.float32)
    # Block-diagonal hidden weight: block (d, d) is wh (H, Hd).
    wh_bd = (eye[:, None, :, None] * wh[None, :, None, :]).reshape(DH, DHd)
    # Expanded per-dim x weight: row d holds wx in columns d*Hd:(d+1)*Hd.
    wx_exp = (eye[:, :, None] * wx[0][None, None, :]).reshape(D, DHd)
    # Fused dimwise weight: rows 0:D*H act on h, rows D*H:D*H+D act on x
    # (matches hx = concat([h, x]) in the kernel).
    whx = jnp.concatenate([wh_bd, wx_exp], axis=0)            # (D*H + D, D*Hd)
    # Block-diagonal output weight stored directly in (D*Hd, D) orientation
    # (pre-transposed on the host -> no in-kernel XLU transpose).
    wo_bd = (eye[:, None, :] * wo[None, :, 0:1]).reshape(DHd, D)

    w_slab = jnp.zeros((rows, lane), jnp.float32)
    w_slab = w_slab.at[off["w1"]:off["w1"] + D, 0:H1].set(w1)
    w_slab = w_slab.at[off["w2"]:off["w2"] + H1, 0:DH].set(w2)
    w_slab = w_slab.at[off["whx"]:off["whx"] + DH + D, 0:DHd].set(whx)
    w_slab = w_slab.at[off["wo"]:off["wo"] + DHd, 0:D].set(wo_bd)

    b_slab = jnp.zeros((8, lane), jnp.float32)
    b_slab = b_slab.at[0, 0:H1].set(b1[0])
    b_slab = b_slab.at[1, 0:H1].set(tb1[0])
    b_slab = b_slab.at[2, 0:DH].set(b2[0])
    b_slab = b_slab.at[3, 0:DHd].set(jnp.tile(wt[0], D))
    b_slab = b_slab.at[4, 0:DHd].set(jnp.tile(bd[0], D))

    return w_slab, b_slab, bo[0, 0]


# --------------------------------------------------------------------------
# Wrapper: grid over batch tiles, weights VMEM-resident, scalars in SMEM
# --------------------------------------------------------------------------
def model_exact(t, x, packed, *, D, H1, H, Hd,
                compute_dtype=jnp.float32, tile_cap=1024):
    w_slab, b_slab, bo = packed
    B, D_ = x.shape
    assert D_ == D

    scalars = jnp.stack(
        [jnp.asarray(t, jnp.float32), jnp.asarray(bo, jnp.float32)]
    ).reshape(1, 2)

    # --- batch tiling -------------------------------------------------------
    # Big tiles amortize the ~0.35us/step overhead; force an even step count
    # >= 2 whenever B > 8 so both v7x TensorCores get work under the
    # "parallel" grid axis (single extra step is negligible on 1-TC chips).
    Bp8 = _round_up(B, 8)
    n_steps = max(1, pl.cdiv(Bp8, tile_cap))
    if B > 8 and n_steps == 1:
        n_steps = 2
    if n_steps > 1 and n_steps % 2 == 1:
        n_steps += 1
    TB = _round_up(pl.cdiv(Bp8, n_steps), 8)
    Bp = _round_up(B, TB)
    xp = x if Bp == B else jnp.pad(x, ((0, Bp - B), (0, 0)))
    grid = (Bp // TB,)

    kernel = functools.partial(
        model_exact_kernel, D=D, H1=H1, H=H, Hd=Hd, compute_dtype=compute_dtype
    )

    out = pl.pallas_call(
        kernel,
        out_shape=jax.ShapeDtypeStruct((Bp, D), jnp.float32),
        grid_spec=pltpu.PrefetchScalarGridSpec(
            num_scalar_prefetch=0,
            grid=grid,
            in_specs=[
                # [t, bo] scalars live in SMEM (no padded VMEM tile for them).
                pl.BlockSpec(memory_space=pltpu.MemorySpace.SMEM),
                pl.BlockSpec((TB, D), lambda i: (i, 0)),
                # Constant index_map: weight/bias slabs stay VMEM-resident
                # across batch tiles (single DMA each, never re-fetched).
                pl.BlockSpec(w_slab.shape, lambda i: (0, 0)),
                pl.BlockSpec(b_slab.shape, lambda i: (0, 0)),
            ],
            out_specs=pl.BlockSpec((TB, D), lambda i: (i, 0)),
        ),
        compiler_params=pltpu.CompilerParams(
            dimension_semantics=("parallel",)
        ),
    )(scalars, xp, w_slab, b_slab)
    return out[:B]


# --------------------------------------------------------------------------
# Pure-JAX reference (original formulation with the .view/.reshape plumbing)
# --------------------------------------------------------------------------
def model_exact_ref(t, x, params):
    (w1, b1, tb1, w2, b2, wx, wh, wt, bd, wo, bo) = params
    B, D = x.shape
    H = wh.shape[0]
    h1 = jnp.tanh(x @ w1 + t * tb1 + b1)
    h = h1 @ w2 + b2
    x_flat = x.reshape(B * D, 1)
    h_flat = h.reshape(B * D, H)
    u = jnp.tanh(x_flat * wx + h_flat @ wh + t * wt + bd)
    o = u @ wo + bo
    return o.reshape(B, D)


if __name__ == "__main__":
    # Small shapes implied by the forward: x is (batch, dim) flow state.
    B, D = 8, 8        # batch, data dim
    H1 = 32            # exclusive_net hidden width
    H = 16             # per-dimension hidden features (exclusive_net output = D*H)
    Hd = 32            # dimwise_net hidden width

    key = jax.random.PRNGKey(0)
    ks = jax.random.split(key, 13)
    scale = 0.1

    x = jax.random.normal(ks[0], (B, D), jnp.float32)
    t = jnp.float32(0.5)

    params = (
        scale * jax.random.normal(ks[1], (D, H1), jnp.float32),      # w1
        scale * jax.random.normal(ks[2], (1, H1), jnp.float32),      # b1
        scale * jax.random.normal(ks[3], (1, H1), jnp.float32),      # tb1
        scale * jax.random.normal(ks[4], (H1, D * H), jnp.float32),  # w2
        scale * jax.random.normal(ks[5], (1, D * H), jnp.float32),   # b2
        scale * jax.random.normal(ks[6], (1, Hd), jnp.float32),      # wx
        scale * jax.random.normal(ks[7], (H, Hd), jnp.float32),      # wh
        scale * jax.random.normal(ks[8], (1, Hd), jnp.float32),      # wt
        scale * jax.random.normal(ks[9], (1, Hd), jnp.float32),      # bd
        scale * jax.random.normal(ks[10], (Hd, 1), jnp.float32),     # wo
        scale * jax.random.normal(ks[11], (1, 1), jnp.float32),      # bo
    )

    packed = pack_params(params, D=D, H1=H1, H=H, Hd=Hd)

    # 1) Small batch (grid=(1,)), f32: tight check against the reference.
    out = jax.block_until_ready(model_exact(t, x, packed, D=D, H1=H1, H=H, Hd=Hd))
    ref = model_exact_ref(t, x, params)
    assert out.shape == x.shape
    assert jnp.allclose(out, ref, atol=1e-4, rtol=1e-4), "mismatch vs reference (B=8)"

    # 2) Larger batch exercising the multi-step grid, batch padding and the
    #    >=2-step (two-TensorCore) tiling path, still f32.
    B2 = 300
    x2 = jax.random.normal(ks[12], (B2, D), jnp.float32)
    out2 = jax.block_until_ready(model_exact(t, x2, packed, D=D, H1=H1, H=H, Hd=Hd))
    ref2 = model_exact_ref(t, x2, params)
    assert out2.shape == x2.shape
    assert jnp.allclose(out2, ref2, atol=1e-4, rtol=1e-4), "mismatch vs reference (B=300)"

    # 3) bf16 MXU operands (the large-batch regime the review targets); f32
    #    accumulation, so only a loose ballpark check vs. the f32 reference —
    #    a wrong packing/ordering would be O(0.1-1) off, far outside this.
    out3 = jax.block_until_ready(
        model_exact(t, x2, packed, D=D, H1=H1, H=H, Hd=Hd, compute_dtype=jnp.bfloat16)
    )
    assert jnp.allclose(out3, ref2, atol=1e-1, rtol=1e-1), "bf16 path mismatch"

    print("KERNEL_OK")
</pallas_src>

<mosaic_0001>
module attributes {stable_mosaic.version = 11 : i64} {
  func.func @model_exact_kernel(%arg0: i32, %arg1: memref<1x2xf32, #tpu.memory_space<smem>>, %arg2: memref<8x8xf32, #tpu.memory_space<vmem>>, %arg3: memref<432x256xf32, #tpu.memory_space<vmem>>, %arg4: memref<8x256xf32, #tpu.memory_space<vmem>>, %arg5: memref<8x8xf32, #tpu.memory_space<vmem>>) attributes {dimension_semantics = [#tpu.dimension_semantics<parallel>], iteration_bounds = array<i64: 1>, scalar_prefetch = 0 : i64, scratch_operands = 0 : i64, tpu.core_type = #tpu.core_type<tc>, window_params = [{transform_indices = @transform_0, window_bounds = array<i64: 1, 2>}, {transform_indices = @transform_1, window_bounds = array<i64: 8, 8>}, {pipeline_mode = #tpu.pipeline_mode<synchronous>, transform_indices = @transform_2, window_bounds = array<i64: 432, 256>}, {pipeline_mode = #tpu.pipeline_mode<synchronous>, transform_indices = @transform_3, window_bounds = array<i64: 8, 256>}, {transform_indices = @transform_4, window_bounds = array<i64: 8, 8>}]} {
    %c0 = arith.constant 0 : index
    %c0_0 = arith.constant 0 : index
    %0 = memref.load %arg1[%c0, %c0_0] : memref<1x2xf32, #tpu.memory_space<smem>>
    %c0_1 = arith.constant 0 : index
    %c1 = arith.constant 1 : index
    %1 = memref.load %arg1[%c0_1, %c1] : memref<1x2xf32, #tpu.memory_space<smem>>
    %c0_2 = arith.constant 0 : index
    %c0_3 = arith.constant 0 : index
    %2 = vector.load %arg2[%c0_2, %c0_3] : memref<8x8xf32, #tpu.memory_space<vmem>>, vector<8x8xf32>
    %c0_4 = arith.constant 0 : index
    %c0_5 = arith.constant 0 : index
    %3 = vector.load %arg3[%c0_4, %c0_5] : memref<432x256xf32, #tpu.memory_space<vmem>>, vector<8x32xf32>
    %c8 = arith.constant 8 : index
    %c0_6 = arith.constant 0 : index
    %4 = vector.load %arg3[%c8, %c0_6] : memref<432x256xf32, #tpu.memory_space<vmem>>, vector<32x128xf32>
    %c40 = arith.constant 40 : index
    %c0_7 = arith.constant 0 : index
    %5 = vector.load %arg3[%c40, %c0_7] : memref<432x256xf32, #tpu.memory_space<vmem>>, vector<136x256xf32>
    %c176 = arith.constant 176 : index
    %c0_8 = arith.constant 0 : index
    %6 = vector.load %arg3[%c176, %c0_8] : memref<432x256xf32, #tpu.memory_space<vmem>>, vector<256x8xf32>
    %c0_9 = arith.constant 0 : index
    %c0_10 = arith.constant 0 : index
    %7 = vector.load %arg4[%c0_9, %c0_10] : memref<8x256xf32, #tpu.memory_space<vmem>>, vector<8x256xf32>
    %8 = vector.extract_strided_slice %7 {offsets = [0, 0], sizes = [1, 32], strides = [1, 1]} : vector<8x256xf32> to vector<1x32xf32>
    %9 = vector.extract_strided_slice %7 {offsets = [1, 0], sizes = [1, 32], strides = [1, 1]} : vector<8x256xf32> to vector<1x32xf32>
    %10 = vector.extract_strided_slice %7 {offsets = [2, 0], sizes = [1, 128], strides = [1, 1]} : vector<8x256xf32> to vector<1x128xf32>
    %11 = vector.extract_strided_slice %7 {offsets = [3, 0], sizes = [1, 256], strides = [1, 1]} : vector<8x256xf32> to vector<1x256xf32>
    %12 = vector.extract_strided_slice %7 {offsets = [4, 0], sizes = [1, 256], strides = [1, 1]} : vector<8x256xf32> to vector<1x256xf32>
    %13 = vector.broadcast %0 : f32 to vector<1x32xf32>
    %14 = arith.mulf %13, %9 : vector<1x32xf32>
    %15 = arith.addf %14, %8 : vector<1x32xf32>
    %16 = vector.broadcast %0 : f32 to vector<1x256xf32>
    %17 = arith.mulf %16, %11 : vector<1x256xf32>
    %18 = arith.addf %17, %12 : vector<1x256xf32>
    %cst = arith.constant dense<0.000000e+00> : vector<8x32xf32>
    %19 = tpu.matmul %2, %3, %cst {dimension_numbers = #tpu.dot_dimension_numbers<[1], [0], [0], [1], [0, 0, 1, 1], [], []>} : vector<8x8xf32>, vector<8x32xf32>, vector<8x32xf32> -> vector<8x32xf32>
    %20 = vector.broadcast %15 : vector<1x32xf32> to vector<8x32xf32>
    %21 = arith.addf %19, %20 : vector<8x32xf32>
    %22 = math.tanh %21 : vector<8x32xf32>
    %cst_11 = arith.constant dense<0.000000e+00> : vector<8x128xf32>
    %23 = tpu.matmul %22, %4, %cst_11 {dimension_numbers = #tpu.dot_dimension_numbers<[1], [0], [0], [1], [0, 0, 1, 1], [], []>} : vector<8x32xf32>, vector<32x128xf32>, vector<8x128xf32> -> vector<8x128xf32>
    %24 = vector.broadcast %10 : vector<1x128xf32> to vector<8x128xf32>
    %25 = arith.addf %23, %24 : vector<8x128xf32>
    %26 = tpu.concatenate %25, %2 in 1 : vector<8x128xf32>, vector<8x8xf32> -> vector<8x136xf32>
    %cst_12 = arith.constant dense<0.000000e+00> : vector<8x256xf32>
    %27 = tpu.matmul %26, %5, %cst_12 {dimension_numbers = #tpu.dot_dimension_numbers<[1], [0], [0], [1], [0, 0, 1, 1], [], []>} : vector<8x136xf32>, vector<136x256xf32>, vector<8x256xf32> -> vector<8x256xf32>
    %28 = vector.broadcast %18 : vector<1x256xf32> to vector<8x256xf32>
    %29 = arith.addf %27, %28 : vector<8x256xf32>
    %30 = math.tanh %29 : vector<8x256xf32>
    %cst_13 = arith.constant dense<0.000000e+00> : vector<8x8xf32>
    %31 = tpu.matmul %30, %6, %cst_13 {dimension_numbers = #tpu.dot_dimension_numbers<[1], [0], [0], [1], [0, 0, 1, 1], [], []>} : vector<8x256xf32>, vector<256x8xf32>, vector<8x8xf32> -> vector<8x8xf32>
    %32 = vector.broadcast %1 : f32 to vector<8x8xf32>
    %33 = arith.addf %31, %32 : vector<8x8xf32>
    %c0_14 = arith.constant 0 : index
    %c0_15 = arith.constant 0 : index
    %34 = vector.load %arg5[%c0_14, %c0_15] : memref<8x8xf32, #tpu.memory_space<vmem>>, vector<8x8xf32>
    tpu.vector_store %arg5[%c0_14, %c0_15], %33 {strides = array<i32>} : memref<8x8xf32, #tpu.memory_space<vmem>>, vector<8x8xf32>,
    return
  }
  func.func @transform_0(%arg0: i32) -> (i32, i32) {
    %c0_i32 = arith.constant 0 : i32
    %c0_i32_0 = arith.constant 0 : i32
    %c0_i32_1 = arith.constant 0 : i32
    return %c0_i32, %c0_i32_0 : i32, i32
  }
  func.func @transform_1(%arg0: i32) -> (i32, i32) {
    %c0_i32 = arith.constant 0 : i32
    %c0_i32_0 = arith.constant 0 : i32
    return %arg0, %c0_i32 : i32, i32
  }
  func.func @transform_2(%arg0: i32) -> (i32, i32) {
    %c0_i32 = arith.constant 0 : i32
    %c0_i32_0 = arith.constant 0 : i32
    %c0_i32_1 = arith.constant 0 : i32
    return %c0_i32, %c0_i32_0 : i32, i32
  }
  func.func @transform_3(%arg0: i32) -> (i32, i32) {
    %c0_i32 = arith.constant 0 : i32
    %c0_i32_0 = arith.constant 0 : i32
    %c0_i32_1 = arith.constant 0 : i32
    return %c0_i32, %c0_i32_0 : i32, i32
  }
  func.func @transform_4(%arg0: i32) -> (i32, i32) {
    %c0_i32 = arith.constant 0 : i32
    %c0_i32_0 = arith.constant 0 : i32
    return %arg0, %c0_i32 : i32, i32
  }
}

</mosaic_0001>

<bundles_post_ra>
// kernel: tpu_custom_call.1
= control target key start
LH: loop header
LB: loop body
LE: loop exit
PB: predicated region body
PF: predicated region fallthrough
CT: control target
= control target key end

     0   :  { %9 = vsyncpa [#allocation5], 0  ;;  %s857_s0 = inlined_call_operand.hbm [shape: f32[1,2], index: 0, kind: input, shape index: {}]   ;;  %s858_s1 = inlined_call_operand.hbm [shape: f32[8,8], index: 1, kind: input, shape index: {}]   ;;  %s859_s2 = inlined_call_operand.hbm [shape: f32[432,256], index: 2, kind: input, shape index: {}]   ;;  %s860_s3 = inlined_call_operand.hbm [shape: f32[8,256], index: 3, kind: input, shape index: {}]   ;;  %s861_s4 = inlined_call_operand.hbm [shape: f32[8,8], index: 4, kind: output, shape index: {}]  }
   0x1   :  { %10 = vsyncpa [#allocation3], 0 }
   0x2   :  { %11 = vsyncpa [#allocation8], 0 }
   0x3   :  { %12 = vsyncpa [#allocation4], 0  ;;  %s737_s15 = smov [#allocation7]   ;;  %s631_s19 = scalar_lea.hbm %s859_s2, 13824 }
   0x4   :  { %s36_s16 = sshll.u32 %s737_s15, 4  ;;  %p632_p0 = scmp.ne.s32.totalorder %s859_s2, %s631_s19  ;;  %s37_s16 = int_to_ptr.vmem [resolvable:$true] %s36_s16 }
   0x5   :  { %p635_p1 = scmp.lt.u32.totalorder %s631_s19, %s859_s2 }
   0x7   :  { %p637_p2 = pnand %p635_p1, %p632_p0 }
   0x9   :  { %640 = shalt.err (!%p637_p2)
}
   0xa   :  { %s641_s24 = scalar_lea.vmem %s37_s16, 13824  ;;  %p646_p4 = scmp.lt.s32.totalorder %s37_s16, %s37_s16 }
   0xb   :  { %p642_p3 = scmp.ne.s32.totalorder %s37_s16, %s641_s24  ;;  %p647_p5 = scmp.lt.s32.totalorder %s641_s24, %s641_s24 }
   0xd   :  { %p648_p6 = por %p647_p5, %p646_p4 }
   0xf   :  { %p649_p7 = pnand %p648_p6, %p642_p3 }
  0x11   :  { %652 = shalt.err (!%p649_p7)
}
  0x12   :  { %s738_s25 = smov 256   ;;  %s739_s26 = smov 16  }
  0x13   :  { %42 = dma.hbm_to_vmem [thread:$0]  %s859_s2, 13824, %s37_s16, [#allocation8], %s738_s25, %s738_s25, %s739_s26  }
  0x14   :  { %s653_s5 = scalar_lea.hbm %s857_s0, 16 }
  0x15   :  { %p654_p8 = scmp.ne.s32.totalorder %s857_s0, %s653_s5  ;;  %p657_p9 = scmp.lt.u32.totalorder %s653_s5, %s857_s0 }
  0x17   :  { %p659_p10 = pnand %p657_p9, %p654_p8 }
  0x19   :  { %662 = shalt.err (!%p659_p10)
}
  0x1a   :  { %s740_s10 = smov [#allocation2]   ;;  %s741_s2 = smov [#allocation6]  }
  0x1b   :  { %20 = dma.hbm_to_smem %s857_s0, 16, %s740_s10, [#allocation5]  }
  0x1c   :  { %s27_s13 = sshll.u32 %s741_s2, 4  ;;  %s742_s14 = smov [#allocation9]   ;;  %s28_s13 = int_to_ptr.vmem [resolvable:$true] %s27_s13 }
  0x1d   :  { %s49_s15 = sshll.u32 %s742_s14, 4  ;;  %s663_s18 = scalar_lea.hbm %s858_s1, 128  ;;  %s50_s15 = int_to_ptr.vmem [resolvable:$true] %s49_s15 }
  0x1e   :  { %p664_p11 = scmp.ne.s32.totalorder %s858_s1, %s663_s18  ;;  %p667_p12 = scmp.lt.u32.totalorder %s663_s18, %s858_s1 }
  0x20   :  { %p669_p13 = pnand %p667_p12, %p664_p11 }
  0x22   :  { %672 = shalt.err (!%p669_p13)
}
  0x23   :  { %s673_s0 = scalar_lea.vmem %s28_s13, 128  ;;  %p678_p1 = scmp.lt.s32.totalorder %s28_s13, %s28_s13 }
  0x24   :  { %p674_p0 = scmp.ne.s32.totalorder %s28_s13, %s673_s0  ;;  %p679_p2 = scmp.lt.s32.totalorder %s673_s0, %s673_s0 }
  0x26   :  { %p680_p3 = por %p679_p2, %p678_p1 }
  0x28   :  { %p681_p4 = pnand %p680_p3, %p674_p0 }
  0x2a   :  { %684 = shalt.err (!%p681_p4)
}
  0x2b   :  { %30 = dma.hbm_to_vmem [thread:$0]  %s858_s1, 128, %s28_s13, [#allocation3]  }
  0x2c   :  { %s685_s27 = scalar_lea.hbm %s860_s3, 256 }
  0x2d   :  { %p686_p5 = scmp.ne.s32.totalorder %s860_s3, %s685_s27  ;;  %p689_p6 = scmp.lt.u32.totalorder %s685_s27, %s860_s3 }
  0x2f   :  { %p691_p7 = pnand %p689_p6, %p686_p5 }
  0x31   :  { %694 = shalt.err (!%p691_p7)
}
  0x32   :  { %s695_s6 = scalar_lea.vmem %s50_s15, 256  ;;  %p700_p9 = scmp.lt.s32.totalorder %s50_s15, %s50_s15 }
  0x33   :  { %p696_p8 = scmp.ne.s32.totalorder %s50_s15, %s695_s6  ;;  %p701_p10 = scmp.lt.s32.totalorder %s695_s6, %s695_s6 }
  0x35   :  { %p702_p11 = por %p701_p10, %p700_p9 }
  0x37   :  { %p703_p12 = pnand %p702_p11, %p696_p8 }
  0x39   :  { %706 = shalt.err (!%p703_p12)
}
  0x3a   :  { %52 = dma.hbm_to_vmem [thread:$0]  %s860_s3, 256, %s50_s15, [#allocation8]  }
  0x3b   :  { %729 = dma.done.wait [#allocation5], 16  }
  0x3c   :  { %730 = vsyncadd [#allocation5], 4294967280 }
  0x3d   :  { %731 = dma.done.wait [#allocation3], 128  }
  0x3e   :  { %732 = vsyncadd [#allocation3], 4294967168 }
  0x3f   :  { %733 = dma.done.wait [#allocation8], 14080  }
  0x40   :  { %734 = vsyncadd [#allocation8], 4294953216 }
  0x41   :  { %65 = sfence }
  0x42   :  { %v69_v0 = vld [vmem:[#allocation7] sm:$0xff]  ;;  %v68_v1 = vld [vmem:[#allocation6] sm:$0xff]  ;;  %vm160_vm0 = vcmask 64512   ;;  %v743_v2 = vmov 0.0   ;;  %vm744_vm1 = vmmov 0   ;;  %v70_v3 = vld [vmem:[#allocation7 + $0x10] sm:$0xff]  ;;  %v156_v58 = vlaneseq }
  0x43   :  { %529 = vmatprep.subr.mxu0 %v743_v2  ;;  %531 = vmatprep.mubr.msk.f32.mxu0 %vm744_vm1, %v743_v2  ;;  %v71_v4 = vld [vmem:[#allocation7 + $0x20] sm:$0xff]  ;;  %v72_v5 = vld [vmem:[#allocation7 + $0x30] sm:$0xff]  ;;  %v745_v6 = vmov 0.0|0.0   ;;  %v75_v10 = vld [vmem:[#allocation7 + $0x58] sm:$0xff]  ;;  %s822_s3 = sld [smem:[#allocation2]]  ;;  %vm239_vm2 = vcmask 261120  }
  0x44   :  { %530 = vmatpush3.msra.mxu0 %v69_v0  ;;  %542 = vmatprep.mubr.msk.f32.mxu1 %vm744_vm1, %v743_v2  ;;  %v546_v7 = vpack.c.bf16 %v71_v4, %v70_v3  ;;  %v73_v8 = vld [vmem:[#allocation7 + $0x40] sm:$0xff]  ;;  %v77_v11 = vld [vmem:[#allocation7 + $0x68] sm:$0xff]  ;;  %v74_v12 = vld [vmem:[#allocation7 + $0x50] sm:$0xff]  ;;  %v833_v63 = vshrl.u32 %v156_v58, 7  ;;  %s483_s8 = sld [smem:[#allocation2 + $0x1]]  ;;  %s746_s9 = smov [#allocation10]  }
  0x45   :  { %532 = vmatmul.mubr.msk.f32.vlgmr.msra.gmra.mrb[0].mxu0 %vm160_vm0, %v68_v1  ;;  %545 = vmatprep.subr.bf16.mxu1 %v745_v6  ;;  %v549_v9 = vpack.c.bf16 %v73_v8, %v72_v5  ;;  %v551_v13 = vpack.c.bf16 %v77_v11, %v75_v10  ;;  %v76_v14 = vld [vmem:[#allocation7 + $0x60] sm:$0xff]  ;;  %v79_v15 = vld [vmem:[#allocation7 + $0x78] sm:$0xff]  ;;  %v81_v16 = vld [vmem:[#allocation7 + $0x88] sm:$0xff]  ;;  %s472_s10 = sshll.u32 %s746_s9, 4  ;;  %s473_s10 = int_to_ptr.vmem [resolvable:$true] %s472_s10 }
  0x46   :  { %486 = vmatprep.mubr.msk.f32.mxu0 %vm160_vm0, %v68_v1  ;;  %547 = vmatpush3.bf16.msra.mxu1 %v546_v7  ;;  %v553_v17 = vpack.c.bf16 %v76_v14, %v74_v12  ;;  %v555_v18 = vpack.c.bf16 %v81_v16, %v79_v15  ;;  %v78_v19 = vld [vmem:[#allocation7 + $0x70] sm:$0xff]  ;;  %v80_v20 = vld [vmem:[#allocation7 + $0x80] sm:$0xff]  ;;  %v83_v21 = vld [vmem:[#allocation7 + $0x98] sm:$0xff]  ;;  %v158_v1 = vsub.s32 1, %v833_v63  ;;  %s707_s11 = scalar_lea.vmem %s473_s10, 128  ;;  %p712_p0 = scmp.lt.s32.totalorder %s473_s10, %s473_s10 }
  0x47   :  { %548 = vmatprep.subr.bf16.mxu1 %v745_v6  ;;  %552 = vmatprep.subr.bf16.mxu0 %v551_v13  ;;  %v85_v22 = vld [vmem:[#allocation7 + $0xa8] sm:$0xff]  ;;  %v557_v23 = vpack.c.bf16 %v80_v20, %v78_v19  ;;  %v82_v25 = vld [vmem:[#allocation7 + $0x90] sm:$0xff]  ;;  %v84_v26 = vld [vmem:[#allocation7 + $0xa0] sm:$0xff]  ;;  %p708_p13 = scmp.ne.s32.totalorder %s473_s10, %s707_s11  ;;  %p713_p1 = scmp.lt.s32.totalorder %s707_s11, %s707_s11 }
  0x48   :  { %554 = vmatpush1.bf16.msra.mxu0 %v553_v17  ;;  %v559_v24 = vpack.c.bf16 %v85_v22, %v83_v21  ;;  %v87_v27 = vld [vmem:[#allocation7 + $0xb8] sm:$0xff]  ;;  %v89_v28 = vld [vmem:[#allocation7 + $0xc8] sm:$0xff]  ;;  %v561_v29 = vpack.c.bf16 %v84_v26, %v82_v25  ;;  %v86_v31 = vld [vmem:[#allocation7 + $0xb0] sm:$0xff] }
  0x49   :  { %556 = vmatprep.subr.bf16.mxu0 %v555_v18  ;;  %v563_v30 = vpack.c.bf16 %v89_v28, %v87_v27  ;;  %v88_v32 = vld [vmem:[#allocation7 + $0xc0] sm:$0xff]  ;;  %v91_v33 = vld [vmem:[#allocation7 + $0xd8] sm:$0xff]  ;;  %v93_v34 = vld [vmem:[#allocation7 + $0xe8] sm:$0xff]  ;;  %v142_v60 = vstv %s822_s3  ;;  %p714_p2 = por %p713_p1, %p712_p0 }
  0x4a   :  { %550 = vmatpush3.bf16.msra.mxu1 %v549_v9  ;;  %v565_v35 = vpack.c.bf16 %v88_v32, %v86_v31  ;;  %v567_v36 = vpack.c.bf16 %v93_v34, %v91_v33  ;;  %v90_v37 = vld [vmem:[#allocation7 + $0xd0] sm:$0xff]  ;;  %v92_v38 = vld [vmem:[#allocation7 + $0xe0] sm:$0xff]  ;;  %v95_v39 = vld [vmem:[#allocation7 + $0xf8] sm:$0xff]  ;;  %v237_v33 = vsub.s32 2, %v833_v63 }
  0x4b   :  { %v97_v40 = vld [vmem:[#allocation7 + $0x108] sm:$0xff]  ;;  %v569_v41 = vpack.c.bf16 %v92_v38, %v90_v37  ;;  %v94_v43 = vld [vmem:[#allocation7 + $0xf0] sm:$0xff]  ;;  %v96_v44 = vld [vmem:[#allocation7 + $0x100] sm:$0xff]  ;;  %p715_p3 = pnand %p714_p2, %p708_p13 }
  0x4c   :  { %558 = vmatpush1.bf16.msra.mxu0 %v557_v23  ;;  %v571_v42 = vpack.c.bf16 %v97_v40, %v95_v39  ;;  %v99_v45 = vld [vmem:[#allocation7 + $0x118] sm:$0xff]  ;;  %v101_v46 = vld [vmem:[#allocation7 + $0x128] sm:$0xff]  ;;  %v573_v47 = vpack.c.bf16 %v96_v44, %v94_v43  ;;  %v98_v49 = vld [vmem:[#allocation7 + $0x110] sm:$0xff] }
  0x4d   :  { %560 = vmatprep.subr.bf16.mxu0 %v559_v24  ;;  %v575_v48 = vpack.c.bf16 %v101_v46, %v99_v45  ;;  %v100_v50 = vld [vmem:[#allocation7 + $0x120] sm:$0xff]  ;;  %v103_v51 = vld [vmem:[#allocation7 + $0x138] sm:$0xff]  ;;  %v105_v52 = vld [vmem:[#allocation7 + $0x148] sm:$0xff] }
  0x4e   :  { %v577_v53 = vpack.c.bf16 %v100_v50, %v98_v49  ;;  %v579_v54 = vpack.c.bf16 %v105_v52, %v103_v51  ;;  %v102_v55 = vld [vmem:[#allocation7 + $0x130] sm:$0xff]  ;;  %v104_v56 = vld [vmem:[#allocation7 + $0x140] sm:$0xff]  ;;  %v107_v7 = vld [vmem:[#allocation7 + $0x158] sm:$0xff] }
  0x4f   :  { %v581_v57 = vpack.c.bf16 %v104_v56, %v102_v55  ;;  %v824_v59 = vld [vmem:[#allocation9] sm:$0xff]  ;;  %v106_v8 = vld [vmem:[#allocation7 + $0x150] sm:$0xff] }
  0x50   :  { %562 = vmatpush1.bf16.msra.mxu0 %v561_v29  ;;  %v830_v61 = vmul.f32 %v142_v60, %v824_v59  ;;  %v145_v62 = vrot.slane %v824_v59, 7  ;;  %v124_v9 = vld [vmem:[#allocation7 + $0x260] sm:$0xff]  ;;  %v125_v10 = vld [vmem:[#allocation7 + $0x270] sm:$0xff]  ;;  %v238_v34 = vrot.slane %v824_v59, %v237_v33 }
  0x51   :  { %564 = vmatprep.subr.bf16.mxu0 %v563_v30  ;;  %v108_v11 = vld [vmem:[#allocation7 + $0x160] sm:$0xff]  ;;  %v583_v12 = vpack.c.bf16 %v125_v10, %v124_v9  ;;  %v109_v13 = vld [vmem:[#allocation7 + $0x170] sm:$0xff] }
  0x52   :  { %v147_v0 = vadd.f32 %v145_v62, %v830_v61  ;;  %v126_v14 = vld [vmem:[#allocation7 + $0x280] sm:$0xff]  ;;  %v127_v15 = vld [vmem:[#allocation7 + $0x290] sm:$0xff]  ;;  %v585_v16 = vpack.c.bf16 %v109_v13, %v108_v11 }
  0x53   :  { %v587_v17 = vpack.c.bf16 %v127_v15, %v126_v14  ;;  %v110_v18 = vld [vmem:[#allocation7 + $0x180] sm:$0xff]  ;;  %v111_v19 = vld [vmem:[#allocation7 + $0x190] sm:$0xff]  ;;  %584 = vmatprep.subr.bf16.mxu1 %v583_v12 }
  0x54   :  { %566 = vmatpush1.bf16.msra.mxu0 %v565_v35  ;;  %v159_v2 = vrot.slane %v147_v0, %v158_v1  ;;  %v128_v20 = vld [vmem:[#allocation7 + $0x2a0] sm:$0xff]  ;;  %v129_v21 = vld [vmem:[#allocation7 + $0x2b0] sm:$0xff]  ;;  %v589_v22 = vpack.c.bf16 %v111_v19, %v110_v18 }
  0x55   :  { %568 = vmatprep.subr.bf16.mxu0 %v567_v36  ;;  %v591_v23 = vpack.c.bf16 %v129_v21, %v128_v20  ;;  %v112_v24 = vld [vmem:[#allocation7 + $0x1a0] sm:$0xff]  ;;  %v113_v25 = vld [vmem:[#allocation7 + $0x1b0] sm:$0xff] }
  0x56   :  { %v130_v26 = vld [vmem:[#allocation7 + $0x2c0] sm:$0xff]  ;;  %v131_v27 = vld [vmem:[#allocation7 + $0x2d0] sm:$0xff]  ;;  %v593_v28 = vpack.c.bf16 %v113_v25, %v112_v24 }
  0x57   :  { %v595_v29 = vpack.c.bf16 %v131_v27, %v130_v26  ;;  %v114_v30 = vld [vmem:[#allocation7 + $0x1c0] sm:$0xff]  ;;  %v115_v31 = vld [vmem:[#allocation7 + $0x1d0] sm:$0xff] }
  0x58   :  { %570 = vmatpush1.bf16.msra.mxu0 %v569_v41  ;;  %v597_v32 = vpack.c.bf16 %v115_v31, %v114_v30  ;;  %v132_v38 = vld [vmem:[#allocation7 + $0x2e0] sm:$0xff]  ;;  %v133_v39 = vld [vmem:[#allocation7 + $0x2f0] sm:$0xff] }
  0x59   :  { %572 = vmatprep.subr.bf16.mxu0 %v571_v42  ;;  %v599_v40 = vpack.c.bf16 %v133_v39, %v132_v38  ;;  %v116_v41 = vld [vmem:[#allocation7 + $0x1e0] sm:$0xff]  ;;  %v117_v42 = vld [vmem:[#allocation7 + $0x1f0] sm:$0xff] }
  0x5a   :  { %v601_v43 = vpack.c.bf16 %v117_v42, %v116_v41  ;;  %v134_v44 = vld [vmem:[#allocation7 + $0x300] sm:$0xff]  ;;  %v135_v45 = vld [vmem:[#allocation7 + $0x310] sm:$0xff] }
  0x5b   :  { %v603_v46 = vpack.c.bf16 %v135_v45, %v134_v44  ;;  %v136_v50 = vld [vmem:[#allocation7 + $0x320] sm:$0xff]  ;;  %v137_v51 = vld [vmem:[#allocation7 + $0x330] sm:$0xff] }
  0x5c   :  { %574 = vmatpush1.bf16.msra.mxu0 %v573_v47  ;;  %v118_v47 = vld [vmem:[#allocation7 + $0x200] sm:$0xff]  ;;  %v139_v56 = vld [vmem:[#allocation7 + $0x350] sm:$0xff] }
  0x5d   :  { %576 = vmatprep.subr.bf16.mxu0 %v575_v48  ;;  %v119_v48 = vld [vmem:[#allocation7 + $0x210] sm:$0xff]  ;;  %v120_v52 = vld [vmem:[#allocation7 + $0x220] sm:$0xff] }
  0x5e   :  { %v605_v49 = vpack.c.bf16 %v119_v48, %v118_v47  ;;  %v138_v55 = vld [vmem:[#allocation7 + $0x340] sm:$0xff]  ;;  %v123_v0 = vld [vmem:[#allocation7 + $0x250] sm:$0xff] }
  0x5f   :  { %v611_v58 = vpack.c.bf16 %v139_v56, %v138_v55  ;;  %v122_v62 = vld [vmem:[#allocation7 + $0x240] sm:$0xff] }
  0x60   :  { %578 = vmatpush1.bf16.msra.mxu0 %v577_v53  ;;  %v607_v53 = vpack.c.bf16 %v137_v51, %v136_v50  ;;  %v613_v1 = vpack.c.bf16 %v123_v0, %v122_v62 }
  0x61   :  { %580 = vmatprep.subr.bf16.mxu0 %v579_v54  ;;  %v121_v54 = vld [vmem:[#allocation7 + $0x230] sm:$0xff] }
  0x64   :  { %582 = vmatpush1.bf16.msra.mxu0 %v581_v57  ;;  %v609_v57 = vpack.c.bf16 %v121_v54, %v120_v52 }
  0x65   :  { %353 = vmatprep.subr.mxu0 %v107_v7  ;;  %v315_v7 = vsub.s32 3, %v833_v63 }
  0x68   :  { %354 = vmatpush1.msra.mxu0 %v106_v8 }
 0x118   :  { %v230_v3 = vpop.f32.mrb[0].mxu0 }
 0x119   :  { %v231_v4 = vadd.f32 %v230_v3, %v159_v2  ;;  %v533_v5 = vpop.f32.mrb[1].mxu0  ;;  %v141_v2 = vld [vmem:[#allocation9 + $0x8] sm:$0xff]  ;;  %v150_v3 = vrot.slane %v824_v59, 1 }
 0x11a   :  { %v151_v5 = vrot.slane %v141_v2, 1 }
 0x11b   :  { %625 = vtanh.f32 %v231_v4  ;;  %v148_v4 = vmul.f32 %v142_v60, %v141_v2 }
 0x11d   :  { %v155_v8 = vadd.f32 %v151_v5, %v148_v4 }
 0x11f   :  { %v320_v10 = vrot.slane %v155_v8, %v315_v7 }
 0x125   :  { %v626_v6 = vpop.eup %625 }
 0x126   :  { %543 = vmatmul.mubr.msk.f32.vlgmr.msra.gmra.mrb[0].mxu1 %vm239_vm2, %v626_v6  ;;  %v154_v6 = vadd.f32 %v150_v3, %v830_v61 }
 0x127   :  { %586 = vmatpush3.bf16.msra.mxu1 %v585_v16 }
 0x128   :  { %588 = vmatprep.subr.bf16.mxu1 %v587_v17  ;;  %v316_v9 = vrot.slane %v154_v6, %v315_v7  ;;  %v394_v17 = vstv %s483_s8 }
 0x12b   :  { %590 = vmatpush3.bf16.msra.mxu1 %v589_v22 }
 0x12c   :  { %592 = vmatprep.subr.bf16.mxu1 %v591_v23 }
 0x12f   :  { %594 = vmatpush3.bf16.msra.mxu1 %v593_v28 }
 0x130   :  { %596 = vmatprep.subr.bf16.mxu1 %v595_v29 }
 0x133   :  { %598 = vmatpush3.bf16.msra.mxu1 %v597_v32 }
 0x134   :  { %600 = vmatprep.subr.bf16.mxu1 %v599_v40 }
 0x137   :  { %602 = vmatpush3.bf16.msra.mxu1 %v601_v43 }
 0x138   :  { %604 = vmatprep.subr.bf16.mxu1 %v603_v46 }
 0x13b   :  { %606 = vmatpush3.bf16.msra.mxu1 %v605_v49 }
 0x13c   :  { %608 = vmatprep.subr.bf16.mxu1 %v607_v53 }
 0x13f   :  { %610 = vmatpush3.bf16.msra.mxu1 %v609_v57 }
 0x140   :  { %612 = vmatprep.subr.bf16.mxu1 %v611_v58 }
 0x143   :  { %614 = vmatpush3.bf16.msra.mxu1 %v613_v1 }
 0x1f9   :  { %v309_v35 = vpop.f32.mrb[0].mxu1 }
 0x1fa   :  { %v310_v36 = vadd.f32 %v309_v35, %v238_v34  ;;  %v544_v37 = vpop.f32.mrb[1].mxu1 }
 0x1fc   :  { %386 = vmatmul.mubr.f32.vlgmr.msra.gmra.mrb[2].mxu0 %v310_v36 }
 0x2cf   :  { %v387_v11 = vpop.f32.mrb[2].mxu0 }
 0x2d0   :  { %v388_v12 = vadd.f32 %v387_v11, %v316_v9  ;;  %v389_v13 = vpop.f32.mrb[3].mxu0 }
 0x2d1   :  { %v390_v14 = vadd.f32 %v389_v13, %v320_v10 }
 0x2d3   :  { %627 = vtanh.f32 %v390_v14 }
 0x2d4   :  { %629 = vtanh.f32 %v388_v12 }
 0x2dd   :  { %v628_v15 = vpop.eup %627 }
 0x2de   :  { %v630_v16 = vpop.eup %629  ;;  %459 = vmatprep.mubr.f32.mxu1 %v628_v15 }
 0x2df   :  { %460 = vmatmul.mubr.f32.vlgmr.msra.gmra.mrb[2].mxu1 %v630_v16 }
 0x3b2   :  { %v526_v59 = vpop.f32.mrb[2].mxu1 }
 0x3b3   :  { %v527_v60 = vpop.f32.mrb[3].mxu1 }
 0x3b4   :  { %v528_v61 = vadd.f32 %v527_v60, %v526_v59 }
 0x3b6   :  { %v462_v63 = vadd.f32 %v528_v61, %v394_v17 }
 0x3b8   :  { %465 = vst.msk [vmem:[#allocation10] sm:$0xff] %vm160_vm0, %v462_v63 }
 0x3b9   :  { %718 = shalt.err (!%p715_p3)
}
 0x3ba   :  { %s719_s13 = scalar_lea.hbm %s861_s4, 128 }
 0x3bb   :  { %p720_p4 = scmp.ne.s32.totalorder %s861_s4, %s719_s13  ;;  %p723_p5 = scmp.lt.u32.totalorder %s719_s13, %s861_s4 }
 0x3bd   :  { %p725_p6 = pnand %p723_p5, %p720_p4 }
 0x3bf   :  { %728 = shalt.err (!%p725_p6)
}
 0x3c0   :  { %475 = dma.vmem_to_hbm [thread:$0]  %s473_s10, 128, %s861_s4, [#allocation4]  }
 0x3c1   :  { %735 = dma.done.wait [#allocation4], 128  }
 0x3c2   :  { %736 = vsyncadd [#allocation4], 4294967168 }
 0x3c3   :  { %479 = vsyncpa [#allocation3], 1 }
 0x3c4   :  { %480 = vsyncpa [#allocation8], 1 }
 0x3c5   :  { %481 = vsyncpa [#allocation4], 1 }
 0x3c6   :  { %482 = vsyncpa [#allocation5], 1 }

</bundles_post_ra>
